<compile_context>
chip_gen: v7x
topology: tpu7x:2x2x1
jax: 0.10.0
libtpu: 0.0.40
codegen_flags: <defaults>
</compile_context>

<pallas_src>
import jax
import jax.numpy as jnp
from jax.experimental import pallas as pl
from jax.experimental.pallas import tpu as pltpu


def _round_up(n, m):
    return (n + m - 1) // m * m


def _elu(x):
    # PyTorch ELU (alpha=1): x if x > 0 else exp(x) - 1
    return jnp.where(x > 0, x, jnp.exp(x) - 1.0)


def mae_kernel(x_ref, w1_ref, w2_ref, b2_ref, w3_ref, b3_ref, w4_ref, b4_ref,
               enc_ref, dec_ref):
    """One batch tile of the fused MaskedAutoencoder forward.

    All weights arrive pre-masked and pre-transposed to (in_features, out_features),
    zero-padded to 128-lane multiples; biases are (1, out_padded) f32.
    """
    wd = w1_ref.dtype  # compute dtype of the matmul operands (f32 or bf16)

    # ---- encoder layer 1 (mask folded into w1, no bias) + ELU (f32) ----
    h1 = _elu(jnp.dot(x_ref[...].astype(wd), w1_ref[...],
                      preferred_element_type=jnp.float32))

    # ---- encoder layer 2 (mask folded into w2) + bias ----
    enc = jnp.dot(h1.astype(wd), w2_ref[...],
                  preferred_element_type=jnp.float32) + b2_ref[...]
    enc_ref[...] = enc.astype(enc_ref.dtype)

    # ---- decoder: Linear -> ELU -> Linear ----
    h3 = _elu(jnp.dot(enc.astype(wd), w3_ref[...],
                      preferred_element_type=jnp.float32) + b3_ref[...])
    dec_ref[...] = (jnp.dot(h3.astype(wd), w4_ref[...],
                            preferred_element_type=jnp.float32)
                    + b4_ref[...]).astype(dec_ref.dtype)


def _masked_autoencoder_forward(x, params, *, compute_dtype=jnp.float32):
    """x: (B, n_vars) float32. params: dict of weights (see init_params)."""
    B, n_vars = x.shape
    n_out1 = params["w1"].shape[0]                   # n_terms + n_dense
    n_terms_sp = params["logits1"].shape[0]          # sparse rows of layer 1
    n_latent = params["w2"].shape[0]
    n_terms_dec = params["w3"].shape[0]

    # ---- fold the eval-mode ('Mode') masks into the weights, pre-transpose to (in, out) ----
    # (done once per call, fused by XLA under jit; kernel never sees logits or `.T`)
    w1_sp = jnp.where(params["logits1"] >= 0.0, params["w1"][:n_terms_sp], 0.0)
    w1m = jnp.concatenate([w1_sp, params["w1"][n_terms_sp:]], axis=0)    # (n_out1, n_vars)
    w2m = jnp.where(params["logits2"] >= 0.0, params["w2"], 0.0)         # (n_latent, n_out1)

    # ---- pad every feature dim to a multiple of 128 (lane-dense vregs, unmasked stores) ----
    Vp = _round_up(n_vars, 128)
    Hp = _round_up(n_out1, 128)
    Lp = _round_up(n_latent, 128)
    Tp = _round_up(n_terms_dec, 128)

    def pad2(a, rows, cols):
        return jnp.pad(a, ((0, rows - a.shape[0]), (0, cols - a.shape[1])))

    w1_t = pad2(w1m.T, Vp, Hp).astype(compute_dtype)
    w2_t = pad2(w2m.T, Hp, Lp).astype(compute_dtype)
    b2 = pad2(params["b2"].reshape(1, -1), 1, Lp).astype(jnp.float32)
    w3_t = pad2(params["w3"].T, Lp, Tp).astype(compute_dtype)
    b3 = pad2(params["b3"].reshape(1, -1), 1, Tp).astype(jnp.float32)
    w4_t = pad2(params["w4"].T, Tp, Vp).astype(compute_dtype)
    b4 = pad2(params["b4"].reshape(1, -1), 1, Vp).astype(jnp.float32)

    # ---- pick a batch tile that keeps the (double-buffered) footprint within VMEM ----
    wt_bytes = jnp.dtype(compute_dtype).itemsize
    x_bytes = jnp.dtype(compute_dtype).itemsize

    def footprint(tb):
        # streamed, double-buffered: x input + enc/dec outputs
        streamed = 2 * tb * (Vp * x_bytes + (Lp + Vp) * 4)
        # in-kernel f32 temporaries (h1, enc, h3) -- single-buffered
        temps = 4 * tb * (Hp + Lp + Tp)
        # resident weights (fetched once, but the pipeliner still reserves 2 buffers)
        wts = 2 * wt_bytes * (Vp * Hp + Hp * Lp + Lp * Tp + Tp * Vp)
        bias = 2 * 4 * (Lp + Tp + Vp)
        return streamed + temps + wts + bias

    VMEM_BUDGET = 20 * 1024 * 1024          # conservative slice of v7x's scoped VMEM
    TB = min(2048, _round_up(B, 8))         # big tiles amortize per-step overhead (~0.35us)
    while TB > 8 and footprint(TB) > VMEM_BUDGET:
        TB = max(8, _round_up(TB // 2, 8))
    Bp = _round_up(B, TB)

    xp = jnp.pad(x, ((0, Bp - B), (0, Vp - n_vars))).astype(compute_dtype)

    grid = (pl.cdiv(Bp, TB),)
    row_spec = lambda cols: pl.BlockSpec((TB, cols), lambda i: (i, 0))
    const_spec = lambda a: pl.BlockSpec(a.shape, lambda i: (0, 0))

    flops_per_row = 2 * (Vp * Hp + Hp * Lp + Lp * Tp + Tp * Vp)
    cost = pl.CostEstimate(
        flops=Bp * flops_per_row,
        transcendentals=Bp * (Hp + Tp),
        bytes_accessed=(xp.size * x_bytes + Bp * (Lp + Vp) * 4
                        + wt_bytes * (Vp * Hp + Hp * Lp + Lp * Tp + Tp * Vp)
                        + 4 * (Lp + Tp + Vp)))

    enc_p, dec_p = pl.pallas_call(
        mae_kernel,
        grid=grid,
        in_specs=[row_spec(Vp),
                  const_spec(w1_t), const_spec(w2_t), const_spec(b2),
                  const_spec(w3_t), const_spec(b3),
                  const_spec(w4_t), const_spec(b4)],
        out_specs=(pl.BlockSpec((TB, Lp), lambda i: (i, 0)),
                   pl.BlockSpec((TB, Vp), lambda i: (i, 0))),
        out_shape=(jax.ShapeDtypeStruct((Bp, Lp), jnp.float32),
                   jax.ShapeDtypeStruct((Bp, Vp), jnp.float32)),
        compiler_params=pltpu.CompilerParams(
            dimension_semantics=("parallel",),        # batch rows independent -> both v7x TCs
            vmem_limit_bytes=32 * 1024 * 1024),       # explicit (raises v5e's 16 MiB default)
        cost_estimate=cost,
    )(xp, w1_t, w2_t, b2, w3_t, b3, w4_t, b4)

    return enc_p[:B, :n_latent], dec_p[:B, :n_vars]


masked_autoencoder_forward = jax.jit(_masked_autoencoder_forward,
                                     static_argnames=("compute_dtype",))


def init_params(key, n_vars, n_terms, n_dense, n_latent):
    """Deterministic synthetic init matching the module's parameter shapes."""
    ks = jax.random.split(key, 10)
    u = lambda k, shape, s: jax.random.uniform(k, shape, jnp.float32, -s, s)
    return {
        # encoder layer 1: MaskedLinear(n_vars, n_terms, n_dense, bias=False)
        "w1": u(ks[0], (n_terms + n_dense, n_vars), 0.5),
        # module zero-inits logits; use random values here so the mask path is exercised
        "logits1": jax.random.normal(ks[1], (n_terms, n_vars), jnp.float32),
        # encoder layer 2: MaskedLinear(n_terms+n_dense, n_latent, 0, bias=True)
        "w2": u(ks[2], (n_latent, n_terms + n_dense), 0.5),
        "b2": u(ks[3], (n_latent,), 0.5),
        "logits2": jax.random.normal(ks[4], (n_latent, n_terms + n_dense), jnp.float32),
        # decoder: Linear(n_latent, n_terms), Linear(n_terms, n_vars)
        "w3": u(ks[5], (n_terms, n_latent), 0.5),
        "b3": u(ks[6], (n_terms,), 0.5),
        "w4": u(ks[7], (n_vars, n_terms), 0.5),
        "b4": u(ks[8], (n_vars,), 0.5),
    }


def reference_forward(x, params):
    """Pure-JAX reference of the eval-mode ('Mode') forward."""
    n_terms = params["logits1"].shape[0]
    mask1 = (params["logits1"] >= 0.0).astype(jnp.float32)
    sp = x @ (params["w1"][:n_terms] * mask1).T
    ds = x @ params["w1"][n_terms:].T
    h1 = jnp.concatenate([sp, ds], axis=1)
    h1 = jnp.where(h1 > 0, h1, jnp.exp(h1) - 1.0)
    mask2 = (params["logits2"] >= 0.0).astype(jnp.float32)
    enc = h1 @ (params["w2"] * mask2).T + params["b2"]
    h3 = enc @ params["w3"].T + params["b3"]
    h3 = jnp.where(h3 > 0, h3, jnp.exp(h3) - 1.0)
    dec = h3 @ params["w4"].T + params["b4"]
    return enc, dec


if __name__ == "__main__":
    B, n_vars, n_terms, n_dense, n_latent = 4, 16, 12, 4, 8

    key = jax.random.PRNGKey(0)
    k_x, k_p = jax.random.split(key)
    x = jax.random.normal(k_x, (B, n_vars), jnp.float32)
    params = init_params(k_p, n_vars, n_terms, n_dense, n_latent)

    enc, dec = jax.block_until_ready(masked_autoencoder_forward(x, params))
    enc_ref, dec_ref = reference_forward(x, params)

    assert enc.shape == (B, n_latent) and dec.shape == (B, n_vars)
    assert jnp.allclose(enc, enc_ref, atol=1e-5, rtol=1e-5)
    assert jnp.allclose(dec, dec_ref, atol=1e-5, rtol=1e-5)
    print("KERNEL_OK")
</pallas_src>

<mosaic_0001>
module attributes {stable_mosaic.version = 11 : i64} {
  func.func @mae_kernel(%arg0: i32, %arg1: memref<8x128xf32, #tpu.memory_space<vmem>>, %arg2: memref<128x128xf32, #tpu.memory_space<vmem>>, %arg3: memref<128x128xf32, #tpu.memory_space<vmem>>, %arg4: memref<1x128xf32, #tpu.memory_space<vmem>>, %arg5: memref<128x128xf32, #tpu.memory_space<vmem>>, %arg6: memref<1x128xf32, #tpu.memory_space<vmem>>, %arg7: memref<128x128xf32, #tpu.memory_space<vmem>>, %arg8: memref<1x128xf32, #tpu.memory_space<vmem>>, %arg9: memref<8x128xf32, #tpu.memory_space<vmem>>, %arg10: memref<8x128xf32, #tpu.memory_space<vmem>>) attributes {dimension_semantics = [#tpu.dimension_semantics<parallel>], iteration_bounds = array<i64: 1>, scalar_prefetch = 0 : i64, scratch_operands = 0 : i64, tpu.core_type = #tpu.core_type<tc>, window_params = [{transform_indices = @transform_0, window_bounds = array<i64: 8, 128>}, {pipeline_mode = #tpu.pipeline_mode<synchronous>, transform_indices = @transform_1, window_bounds = array<i64: 128, 128>}, {pipeline_mode = #tpu.pipeline_mode<synchronous>, transform_indices = @transform_2, window_bounds = array<i64: 128, 128>}, {pipeline_mode = #tpu.pipeline_mode<synchronous>, transform_indices = @transform_3, window_bounds = array<i64: 1, 128>}, {pipeline_mode = #tpu.pipeline_mode<synchronous>, transform_indices = @transform_4, window_bounds = array<i64: 128, 128>}, {pipeline_mode = #tpu.pipeline_mode<synchronous>, transform_indices = @transform_5, window_bounds = array<i64: 1, 128>}, {pipeline_mode = #tpu.pipeline_mode<synchronous>, transform_indices = @transform_6, window_bounds = array<i64: 128, 128>}, {pipeline_mode = #tpu.pipeline_mode<synchronous>, transform_indices = @transform_7, window_bounds = array<i64: 1, 128>}, {transform_indices = @transform_8, window_bounds = array<i64: 8, 128>}, {transform_indices = @transform_9, window_bounds = array<i64: 8, 128>}]} {
    %c0 = arith.constant 0 : index
    %c0_0 = arith.constant 0 : index
    %0 = vector.load %arg1[%c0, %c0_0] : memref<8x128xf32, #tpu.memory_space<vmem>>, vector<8x128xf32>
    %c0_1 = arith.constant 0 : index
    %c0_2 = arith.constant 0 : index
    %1 = vector.load %arg2[%c0_1, %c0_2] : memref<128x128xf32, #tpu.memory_space<vmem>>, vector<128x128xf32>
    %cst = arith.constant dense<0.000000e+00> : vector<8x128xf32>
    %2 = tpu.matmul %0, %1, %cst {dimension_numbers = #tpu.dot_dimension_numbers<[1], [0], [0], [1], [0, 0, 1, 1], [], []>} : vector<8x128xf32>, vector<128x128xf32>, vector<8x128xf32> -> vector<8x128xf32>
    %cst_3 = arith.constant 0.000000e+00 : f32
    %3 = vector.broadcast %cst_3 : f32 to vector<8x128xf32>
    %4 = arith.cmpf ogt, %2, %3 : vector<8x128xf32>
    %5 = math.exp %2 : vector<8x128xf32>
    %cst_4 = arith.constant 1.000000e+00 : f32
    %6 = vector.broadcast %cst_4 : f32 to vector<8x128xf32>
    %7 = arith.subf %5, %6 : vector<8x128xf32>
    %8 = arith.select %4, %2, %7 : vector<8x128xi1>, vector<8x128xf32>
    %c0_5 = arith.constant 0 : index
    %c0_6 = arith.constant 0 : index
    %9 = vector.load %arg3[%c0_5, %c0_6] : memref<128x128xf32, #tpu.memory_space<vmem>>, vector<128x128xf32>
    %cst_7 = arith.constant dense<0.000000e+00> : vector<8x128xf32>
    %10 = tpu.matmul %8, %9, %cst_7 {dimension_numbers = #tpu.dot_dimension_numbers<[1], [0], [0], [1], [0, 0, 1, 1], [], []>} : vector<8x128xf32>, vector<128x128xf32>, vector<8x128xf32> -> vector<8x128xf32>
    %c0_8 = arith.constant 0 : index
    %c0_9 = arith.constant 0 : index
    %11 = vector.load %arg4[%c0_8, %c0_9] : memref<1x128xf32, #tpu.memory_space<vmem>>, vector<1x128xf32>
    %12 = vector.broadcast %11 : vector<1x128xf32> to vector<8x128xf32>
    %13 = arith.addf %10, %12 : vector<8x128xf32>
    %c0_10 = arith.constant 0 : index
    %c0_11 = arith.constant 0 : index
    %14 = vector.load %arg9[%c0_10, %c0_11] : memref<8x128xf32, #tpu.memory_space<vmem>>, vector<8x128xf32>
    tpu.vector_store %arg9[%c0_10, %c0_11], %13 {strides = array<i32>} : memref<8x128xf32, #tpu.memory_space<vmem>>, vector<8x128xf32>,
    %c0_12 = arith.constant 0 : index
    %c0_13 = arith.constant 0 : index
    %15 = vector.load %arg5[%c0_12, %c0_13] : memref<128x128xf32, #tpu.memory_space<vmem>>, vector<128x128xf32>
    %cst_14 = arith.constant dense<0.000000e+00> : vector<8x128xf32>
    %16 = tpu.matmul %13, %15, %cst_14 {dimension_numbers = #tpu.dot_dimension_numbers<[1], [0], [0], [1], [0, 0, 1, 1], [], []>} : vector<8x128xf32>, vector<128x128xf32>, vector<8x128xf32> -> vector<8x128xf32>
    %c0_15 = arith.constant 0 : index
    %c0_16 = arith.constant 0 : index
    %17 = vector.load %arg6[%c0_15, %c0_16] : memref<1x128xf32, #tpu.memory_space<vmem>>, vector<1x128xf32>
    %18 = vector.broadcast %17 : vector<1x128xf32> to vector<8x128xf32>
    %19 = arith.addf %16, %18 : vector<8x128xf32>
    %cst_17 = arith.constant 0.000000e+00 : f32
    %20 = vector.broadcast %cst_17 : f32 to vector<8x128xf32>
    %21 = arith.cmpf ogt, %19, %20 : vector<8x128xf32>
    %22 = math.exp %19 : vector<8x128xf32>
    %cst_18 = arith.constant 1.000000e+00 : f32
    %23 = vector.broadcast %cst_18 : f32 to vector<8x128xf32>
    %24 = arith.subf %22, %23 : vector<8x128xf32>
    %25 = arith.select %21, %19, %24 : vector<8x128xi1>, vector<8x128xf32>
    %c0_19 = arith.constant 0 : index
    %c0_20 = arith.constant 0 : index
    %26 = vector.load %arg7[%c0_19, %c0_20] : memref<128x128xf32, #tpu.memory_space<vmem>>, vector<128x128xf32>
    %cst_21 = arith.constant dense<0.000000e+00> : vector<8x128xf32>
    %27 = tpu.matmul %25, %26, %cst_21 {dimension_numbers = #tpu.dot_dimension_numbers<[1], [0], [0], [1], [0, 0, 1, 1], [], []>} : vector<8x128xf32>, vector<128x128xf32>, vector<8x128xf32> -> vector<8x128xf32>
    %c0_22 = arith.constant 0 : index
    %c0_23 = arith.constant 0 : index
    %28 = vector.load %arg8[%c0_22, %c0_23] : memref<1x128xf32, #tpu.memory_space<vmem>>, vector<1x128xf32>
    %29 = vector.broadcast %28 : vector<1x128xf32> to vector<8x128xf32>
    %30 = arith.addf %27, %29 : vector<8x128xf32>
    %c0_24 = arith.constant 0 : index
    %c0_25 = arith.constant 0 : index
    %31 = vector.load %arg10[%c0_24, %c0_25] : memref<8x128xf32, #tpu.memory_space<vmem>>, vector<8x128xf32>
    tpu.vector_store %arg10[%c0_24, %c0_25], %30 {strides = array<i32>} : memref<8x128xf32, #tpu.memory_space<vmem>>, vector<8x128xf32>,
    return
  }
  func.func @transform_0(%arg0: i32) -> (i32, i32) {
    %c0_i32 = arith.constant 0 : i32
    %c0_i32_0 = arith.constant 0 : i32
    return %arg0, %c0_i32 : i32, i32
  }
  func.func @transform_1(%arg0: i32) -> (i32, i32) {
    %c0_i32 = arith.constant 0 : i32
    %c0_i32_0 = arith.constant 0 : i32
    %c0_i32_1 = arith.constant 0 : i32
    return %c0_i32, %c0_i32_0 : i32, i32
  }
  func.func @transform_2(%arg0: i32) -> (i32, i32) {
    %c0_i32 = arith.constant 0 : i32
    %c0_i32_0 = arith.constant 0 : i32
    %c0_i32_1 = arith.constant 0 : i32
    return %c0_i32, %c0_i32_0 : i32, i32
  }
  func.func @transform_3(%arg0: i32) -> (i32, i32) {
    %c0_i32 = arith.constant 0 : i32
    %c0_i32_0 = arith.constant 0 : i32
    %c0_i32_1 = arith.constant 0 : i32
    return %c0_i32, %c0_i32_0 : i32, i32
  }
  func.func @transform_4(%arg0: i32) -> (i32, i32) {
    %c0_i32 = arith.constant 0 : i32
    %c0_i32_0 = arith.constant 0 : i32
    %c0_i32_1 = arith.constant 0 : i32
    return %c0_i32, %c0_i32_0 : i32, i32
  }
  func.func @transform_5(%arg0: i32) -> (i32, i32) {
    %c0_i32 = arith.constant 0 : i32
    %c0_i32_0 = arith.constant 0 : i32
    %c0_i32_1 = arith.constant 0 : i32
    return %c0_i32, %c0_i32_0 : i32, i32
  }
  func.func @transform_6(%arg0: i32) -> (i32, i32) {
    %c0_i32 = arith.constant 0 : i32
    %c0_i32_0 = arith.constant 0 : i32
    %c0_i32_1 = arith.constant 0 : i32
    return %c0_i32, %c0_i32_0 : i32, i32
  }
  func.func @transform_7(%arg0: i32) -> (i32, i32) {
    %c0_i32 = arith.constant 0 : i32
    %c0_i32_0 = arith.constant 0 : i32
    %c0_i32_1 = arith.constant 0 : i32
    return %c0_i32, %c0_i32_0 : i32, i32
  }
  func.func @transform_8(%arg0: i32) -> (i32, i32) {
    %c0_i32 = arith.constant 0 : i32
    %c0_i32_0 = arith.constant 0 : i32
    return %arg0, %c0_i32 : i32, i32
  }
  func.func @transform_9(%arg0: i32) -> (i32, i32) {
    %c0_i32 = arith.constant 0 : i32
    %c0_i32_0 = arith.constant 0 : i32
    return %arg0, %c0_i32 : i32, i32
  }
}

</mosaic_0001>

<bundles_post_ra>
// kernel: _masked_autoencoder_forward.1
= control target key start
LH: loop header
LB: loop body
LE: loop exit
PB: predicated region body
PF: predicated region fallthrough
CT: control target
= control target key end

     0   :  { %v733_v0 = vmov 0.0|0.0   ;;  %vm734_vm0 = vmmov 0   ;;  %v735_v4 = vmov 0.0   ;;  %s1036_s1 = inlined_call_operand.vmem [shape: f32[128,128], index: 1, kind: input, shape index: {}]   ;;  %s1037_s2 = inlined_call_operand.vmem [shape: f32[128,128], index: 2, kind: input, shape index: {}]   ;;  %s1038_s0 = inlined_call_operand.vmem [shape: f32[8,128], index: 0, kind: input, shape index: {}]   ;;  %s1039_s4 = inlined_call_operand.vmem [shape: f32[128,128], index: 4, kind: input, shape index: {}]   ;;  %s1040_s6 = inlined_call_operand.vmem [shape: f32[128,128], index: 6, kind: input, shape index: {}]   ;;  %s1041_s3 = inlined_call_operand.vmem [shape: f32[1,128], index: 3, kind: input, shape index: {}]   ;;  %s1042_s8 = inlined_call_operand.vmem [shape: f32[8,128], index: 8, kind: output, shape index: {0}]   ;;  %s1043_s5 = inlined_call_operand.vmem [shape: f32[1,128], index: 5, kind: input, shape index: {}]   ;;  %s1044_s7 = inlined_call_operand.vmem [shape: f32[1,128], index: 7, kind: input, shape index: {}]   ;;  %s1045_s9 = inlined_call_operand.vmem [shape: f32[8,128], index: 9, kind: output, shape index: {1}]  }
   0x1   :  { %630 = vmatprep.subr.bf16.mxu0 %v733_v0  ;;  %v32_v1 = vld [vmem:[%s1036_s1] sm:$0xff]  ;;  %v33_v2 = vld [vmem:[%s1036_s1 + $0x8] sm:$0xff]  ;;  %v34_v3 = vld [vmem:[%s1036_s1 + $0x10] sm:$0xff]  ;;  %522 = vmatprep.mubr.msk.f32.mxu0 %vm734_vm0, %v735_v4 }
   0x2   :  { %v631_v5 = vpack.c.bf16 %v33_v2, %v32_v1  ;;  %v35_v6 = vld [vmem:[%s1036_s1 + $0x18] sm:$0xff]  ;;  %654 = vmatprep.subr.bf16.mxu1 %v733_v0  ;;  %557 = vmatprep.mubr.msk.f32.mxu1 %vm734_vm0, %v735_v4  ;;  %v36_v8 = vld [vmem:[%s1036_s1 + $0x20] sm:$0xff]  ;;  %v37_v9 = vld [vmem:[%s1036_s1 + $0x28] sm:$0xff] }
   0x3   :  { %v634_v7 = vpack.c.bf16 %v35_v6, %v34_v3  ;;  %v123_v10 = vld [vmem:[%s1037_s2] sm:$0xff]  ;;  %v124_v11 = vld [vmem:[%s1037_s2 + $0x8] sm:$0xff]  ;;  %v125_v12 = vld [vmem:[%s1037_s2 + $0x10] sm:$0xff]  ;;  %v637_v14 = vpack.c.bf16 %v37_v9, %v36_v8 }
   0x4   :  { %632 = vmatpush3.bf16.msra.mxu0 %v631_v5  ;;  %v126_v13 = vld [vmem:[%s1037_s2 + $0x18] sm:$0xff]  ;;  %v655_v15 = vpack.c.bf16 %v124_v11, %v123_v10  ;;  %v38_v16 = vld [vmem:[%s1036_s1 + $0x30] sm:$0xff]  ;;  %v127_v19 = vld [vmem:[%s1037_s2 + $0x20] sm:$0xff] }
   0x5   :  { %633 = vmatprep.subr.bf16.mxu0 %v733_v0  ;;  %v39_v17 = vld [vmem:[%s1036_s1 + $0x38] sm:$0xff]  ;;  %v658_v18 = vpack.c.bf16 %v126_v13, %v125_v12  ;;  %v128_v20 = vld [vmem:[%s1037_s2 + $0x28] sm:$0xff]  ;;  %v40_v22 = vld [vmem:[%s1036_s1 + $0x40] sm:$0xff] }
   0x6   :  { %656 = vmatpush3.bf16.msra.mxu1 %v655_v15  ;;  %v640_v21 = vpack.c.bf16 %v39_v17, %v38_v16  ;;  %v41_v23 = vld [vmem:[%s1036_s1 + $0x48] sm:$0xff]  ;;  %v661_v24 = vpack.c.bf16 %v128_v20, %v127_v19  ;;  %v129_v25 = vld [vmem:[%s1037_s2 + $0x30] sm:$0xff]  ;;  %v130_v26 = vld [vmem:[%s1037_s2 + $0x38] sm:$0xff] }
   0x7   :  { %657 = vmatprep.subr.bf16.mxu1 %v733_v0  ;;  %v643_v27 = vpack.c.bf16 %v41_v23, %v40_v22  ;;  %v42_v28 = vld [vmem:[%s1036_s1 + $0x50] sm:$0xff]  ;;  %v43_v29 = vld [vmem:[%s1036_s1 + $0x58] sm:$0xff]  ;;  %v664_v30 = vpack.c.bf16 %v130_v26, %v129_v25  ;;  %v44_v32 = vld [vmem:[%s1036_s1 + $0x60] sm:$0xff] }
   0x8   :  { %635 = vmatpush3.bf16.msra.mxu0 %v634_v7  ;;  %v646_v31 = vpack.c.bf16 %v43_v29, %v42_v28  ;;  %v45_v33 = vld [vmem:[%s1036_s1 + $0x68] sm:$0xff]  ;;  %v46_v35 = vld [vmem:[%s1036_s1 + $0x70] sm:$0xff]  ;;  %v47_v36 = vld [vmem:[%s1036_s1 + $0x78] sm:$0xff] }
   0x9   :  { %636 = vmatprep.subr.bf16.mxu0 %v733_v0  ;;  %v649_v34 = vpack.c.bf16 %v45_v33, %v44_v32  ;;  %v652_v37 = vpack.c.bf16 %v47_v36, %v46_v35  ;;  %v31_v38 = vld [vmem:[%s1038_s0] sm:$0xff]  ;;  %v132_v40 = vld [vmem:[%s1037_s2 + $0x48] sm:$0xff]  ;;  %v133_v42 = vld [vmem:[%s1037_s2 + $0x50] sm:$0xff] }
   0xa   :  { %659 = vmatpush3.bf16.msra.mxu1 %v658_v18  ;;  %v131_v39 = vld [vmem:[%s1037_s2 + $0x40] sm:$0xff]  ;;  %v134_v43 = vld [vmem:[%s1037_s2 + $0x58] sm:$0xff]  ;;  %v136_v46 = vld [vmem:[%s1037_s2 + $0x68] sm:$0xff] }
   0xb   :  { %660 = vmatprep.subr.bf16.mxu1 %v733_v0  ;;  %v667_v41 = vpack.c.bf16 %v132_v40, %v131_v39  ;;  %v135_v44 = vld [vmem:[%s1037_s2 + $0x60] sm:$0xff]  ;;  %v670_v45 = vpack.c.bf16 %v134_v43, %v133_v42  ;;  %v137_v48 = vld [vmem:[%s1037_s2 + $0x70] sm:$0xff]  ;;  %v138_v49 = vld [vmem:[%s1037_s2 + $0x78] sm:$0xff] }
   0xc   :  { %638 = vmatpush3.bf16.msra.mxu0 %v637_v14  ;;  %v673_v47 = vpack.c.bf16 %v136_v46, %v135_v44  ;;  %v676_v50 = vpack.c.bf16 %v138_v49, %v137_v48  ;;  %v217_v51 = vld [vmem:[%s1039_s4] sm:$0xff]  ;;  %v218_v52 = vld [vmem:[%s1039_s4 + $0x8] sm:$0xff]  ;;  %v219_v53 = vld [vmem:[%s1039_s4 + $0x10] sm:$0xff] }
   0xd   :  { %639 = vmatprep.subr.bf16.mxu0 %v733_v0  ;;  %v679_v54 = vpack.c.bf16 %v218_v52, %v217_v51  ;;  %v220_v55 = vld [vmem:[%s1039_s4 + $0x18] sm:$0xff]  ;;  %v221_v57 = vld [vmem:[%s1039_s4 + $0x20] sm:$0xff]  ;;  %v222_v58 = vld [vmem:[%s1039_s4 + $0x28] sm:$0xff] }
   0xe   :  { %662 = vmatpush3.bf16.msra.mxu1 %v661_v24  ;;  %v682_v56 = vpack.c.bf16 %v220_v55, %v219_v53  ;;  %v685_v59 = vpack.c.bf16 %v222_v58, %v221_v57  ;;  %v223_v60 = vld [vmem:[%s1039_s4 + $0x30] sm:$0xff]  ;;  %v224_v61 = vld [vmem:[%s1039_s4 + $0x38] sm:$0xff]  ;;  %v225_v63 = vld [vmem:[%s1039_s4 + $0x40] sm:$0xff] }
   0xf   :  { %663 = vmatprep.subr.bf16.mxu1 %v733_v0  ;;  %v688_v62 = vpack.c.bf16 %v224_v61, %v223_v60  ;;  %v226_v1 = vld [vmem:[%s1039_s4 + $0x48] sm:$0xff]  ;;  %v227_v3 = vld [vmem:[%s1039_s4 + $0x50] sm:$0xff]  ;;  %v228_v5 = vld [vmem:[%s1039_s4 + $0x58] sm:$0xff] }
  0x10   :  { %641 = vmatpush3.bf16.msra.mxu0 %v640_v21  ;;  %v691_v2 = vpack.c.bf16 %v226_v1, %v225_v63  ;;  %v694_v6 = vpack.c.bf16 %v228_v5, %v227_v3  ;;  %v229_v7 = vld [vmem:[%s1039_s4 + $0x60] sm:$0xff]  ;;  %v230_v8 = vld [vmem:[%s1039_s4 + $0x68] sm:$0xff]  ;;  %v231_v16 = vld [vmem:[%s1039_s4 + $0x70] sm:$0xff] }
  0x11   :  { %642 = vmatprep.subr.bf16.mxu0 %v733_v0  ;;  %v697_v9 = vpack.c.bf16 %v230_v8, %v229_v7  ;;  %v232_v17 = vld [vmem:[%s1039_s4 + $0x78] sm:$0xff]  ;;  %v315_v19 = vld [vmem:[%s1040_s6] sm:$0xff]  ;;  %v316_v20 = vld [vmem:[%s1040_s6 + $0x8] sm:$0xff] }
  0x12   :  { %665 = vmatpush3.bf16.msra.mxu1 %v664_v30  ;;  %v700_v18 = vpack.c.bf16 %v232_v17, %v231_v16  ;;  %v703_v21 = vpack.c.bf16 %v316_v20, %v315_v19  ;;  %v318_v22 = vld [vmem:[%s1040_s6 + $0x18] sm:$0xff]  ;;  %v319_v24 = vld [vmem:[%s1040_s6 + $0x20] sm:$0xff]  ;;  %v320_v25 = vld [vmem:[%s1040_s6 + $0x28] sm:$0xff] }
  0x13   :  { %666 = vmatprep.subr.bf16.mxu1 %v733_v0  ;;  %v709_v26 = vpack.c.bf16 %v320_v25, %v319_v24  ;;  %v322_v32 = vld [vmem:[%s1040_s6 + $0x38] sm:$0xff]  ;;  %v324_v35 = vld [vmem:[%s1040_s6 + $0x48] sm:$0xff]  ;;  %v327_v39 = vld [vmem:[%s1040_s6 + $0x60] sm:$0xff] }
  0x14   :  { %644 = vmatpush3.bf16.msra.mxu0 %v643_v27  ;;  %v418_v27 = vld [vmem:[%s1041_s3] ss:$0 sm:$0xff]  ;;  %v329_v43 = vld [vmem:[%s1040_s6 + $0x70] sm:$0xff]  ;;  %v330_v44 = vld [vmem:[%s1040_s6 + $0x78] sm:$0xff] }
  0x15   :  { %645 = vmatprep.subr.bf16.mxu0 %v733_v0  ;;  %v419_v46 = vld [vmem:[%s1043_s5] ss:$0 sm:$0xff] }
  0x16   :  { %668 = vmatpush3.bf16.msra.mxu1 %v667_v41  ;;  %v328_v41 = vld [vmem:[%s1040_s6 + $0x68] sm:$0xff] }
  0x17   :  { %669 = vmatprep.subr.bf16.mxu1 %v733_v0  ;;  %v721_v42 = vpack.c.bf16 %v328_v41, %v327_v39 }
  0x18   :  { %647 = vmatpush3.bf16.msra.mxu0 %v646_v31  ;;  %v321_v31 = vld [vmem:[%s1040_s6 + $0x30] sm:$0xff] }
  0x19   :  { %648 = vmatprep.subr.bf16.mxu0 %v733_v0  ;;  %v712_v33 = vpack.c.bf16 %v322_v32, %v321_v31 }
  0x1a   :  { %671 = vmatpush3.bf16.msra.mxu1 %v670_v45  ;;  %v724_v45 = vpack.c.bf16 %v330_v44, %v329_v43 }
  0x1b   :  { %672 = vmatprep.subr.bf16.mxu1 %v733_v0 }
  0x1c   :  { %650 = vmatpush3.bf16.msra.mxu0 %v649_v34  ;;  %v323_v34 = vld [vmem:[%s1040_s6 + $0x40] sm:$0xff] }
  0x1d   :  { %651 = vmatprep.subr.bf16.mxu0 %v733_v0  ;;  %v715_v36 = vpack.c.bf16 %v324_v35, %v323_v34 }
  0x1e   :  { %674 = vmatpush3.bf16.msra.mxu1 %v673_v47 }
  0x1f   :  { %675 = vmatprep.subr.bf16.mxu1 %v733_v0 }
  0x20   :  { %653 = vmatpush3.bf16.msra.mxu0 %v652_v37  ;;  %v325_v37 = vld [vmem:[%s1040_s6 + $0x50] sm:$0xff] }
  0x21   :  { %678 = vmatprep.subr.bf16.mxu0 %v733_v0 }
  0x22   :  { %677 = vmatpush3.bf16.msra.mxu1 %v676_v50 }
  0x23   :  { %523 = vmatmul.mubr.f32.vlgmr.msra.gmra.mrb[0].mxu0 %v31_v38  ;;  %702 = vmatprep.subr.bf16.mxu1 %v733_v0  ;;  %v326_v38 = vld [vmem:[%s1040_s6 + $0x58] sm:$0xff] }
  0x24   :  { %592 = vmatprep.mubr.msk.f32.mxu0 %vm734_vm0, %v735_v4  ;;  %680 = vmatpush3.bf16.msra.mxu0 %v679_v54  ;;  %v718_v40 = vpack.c.bf16 %v326_v38, %v325_v37  ;;  %v421_v54 = vld [vmem:[%s1044_s7] ss:$0 sm:$0xff] }
  0x25   :  { %681 = vmatprep.subr.bf16.mxu0 %v733_v0 }
  0x28   :  { %683 = vmatpush3.bf16.msra.mxu0 %v682_v56 }
  0x29   :  { %684 = vmatprep.subr.bf16.mxu0 %v733_v0 }
  0x2c   :  { %686 = vmatpush3.bf16.msra.mxu0 %v685_v59 }
  0x2d   :  { %687 = vmatprep.subr.bf16.mxu0 %v733_v0 }
  0x30   :  { %689 = vmatpush3.bf16.msra.mxu0 %v688_v62 }
  0x31   :  { %690 = vmatprep.subr.bf16.mxu0 %v733_v0 }
  0x34   :  { %692 = vmatpush3.bf16.msra.mxu0 %v691_v2 }
  0x35   :  { %693 = vmatprep.subr.bf16.mxu0 %v733_v0 }
  0x38   :  { %695 = vmatpush3.bf16.msra.mxu0 %v694_v6 }
  0x39   :  { %696 = vmatprep.subr.bf16.mxu0 %v733_v0 }
  0x3c   :  { %698 = vmatpush3.bf16.msra.mxu0 %v697_v9 }
  0x3d   :  { %699 = vmatprep.subr.bf16.mxu0 %v733_v0 }
  0x40   :  { %701 = vmatpush3.bf16.msra.mxu0 %v700_v18 }
  0xf6   :  { %v114_v10 = vpop.f32.mrb[0].mxu0 }
  0xf7   :  { %v119_v11 = vmul.f32 1.442695, %v114_v10  ;;  %v524_v12 = vpop.f32.mrb[1].mxu0  ;;  %vm118_vm1 = vcmp.gt.f32.partialorder %v114_v10, 0.0 }
  0xf9   :  { %729 = vpow2.f32 %v119_v11 }
 0x103   :  { %v730_v13 = vpop.eup %729 }
 0x104   :  { %v417_v14 = vadd.f32 -1.0, %v730_v13 }
 0x106   :  { %v122_v15 = vsel %vm118_vm1, %v114_v10, %v417_v14 }
 0x107   :  { %558 = vmatmul.mubr.f32.vlgmr.msra.gmra.mrb[0].mxu1 %v122_v15 }
 0x108   :  { %627 = vmatprep.mubr.msk.f32.mxu1 %vm734_vm0, %v735_v4  ;;  %v317_v4 = vld [vmem:[%s1040_s6 + $0x10] sm:$0xff]  ;;  %704 = vmatpush3.bf16.msra.mxu1 %v703_v21 }
 0x109   :  { %v706_v23 = vpack.c.bf16 %v318_v22, %v317_v4  ;;  %705 = vmatprep.subr.bf16.mxu1 %v733_v0 }
 0x10c   :  { %707 = vmatpush3.bf16.msra.mxu1 %v706_v23 }
 0x10d   :  { %708 = vmatprep.subr.bf16.mxu1 %v733_v0 }
 0x110   :  { %710 = vmatpush3.bf16.msra.mxu1 %v709_v26 }
 0x111   :  { %711 = vmatprep.subr.bf16.mxu1 %v733_v0 }
 0x114   :  { %713 = vmatpush3.bf16.msra.mxu1 %v712_v33 }
 0x115   :  { %714 = vmatprep.subr.bf16.mxu1 %v733_v0 }
 0x118   :  { %716 = vmatpush3.bf16.msra.mxu1 %v715_v36 }
 0x119   :  { %717 = vmatprep.subr.bf16.mxu1 %v733_v0 }
 0x11c   :  { %719 = vmatpush3.bf16.msra.mxu1 %v718_v40 }
 0x11d   :  { %720 = vmatprep.subr.bf16.mxu1 %v733_v0 }
 0x120   :  { %722 = vmatpush3.bf16.msra.mxu1 %v721_v42 }
 0x121   :  { %723 = vmatprep.subr.bf16.mxu1 %v733_v0 }
 0x124   :  { %725 = vmatpush3.bf16.msra.mxu1 %v724_v45 }
 0x1da   :  { %v212_v28 = vpop.f32.mrb[0].mxu1 }
 0x1db   :  { %v213_v29 = vadd.f32 %v418_v27, %v212_v28  ;;  %v559_v30 = vpop.f32.mrb[1].mxu1 }
 0x1dd   :  { %216 = vst [vmem:[%s1042_s8] sm:$0xff] %v213_v29  ;;  %593 = vmatmul.mubr.f32.vlgmr.msra.gmra.mrb[2].mxu0 %v213_v29 }
 0x2b0   :  { %v306_v47 = vpop.f32.mrb[2].mxu0 }
 0x2b1   :  { %v307_v48 = vadd.f32 %v419_v46, %v306_v47  ;;  %v594_v49 = vpop.f32.mrb[3].mxu0 }
 0x2b3   :  { %v311_v50 = vmul.f32 1.442695, %v307_v48  ;;  %vm310_vm2 = vcmp.gt.f32.partialorder %v307_v48, 0.0 }
 0x2b5   :  { %731 = vpow2.f32 %v311_v50 }
 0x2bf   :  { %v732_v51 = vpop.eup %731 }
 0x2c0   :  { %v420_v52 = vadd.f32 -1.0, %v732_v51 }
 0x2c2   :  { %v314_v53 = vsel %vm310_vm2, %v307_v48, %v420_v52 }
 0x2c3   :  { %628 = vmatmul.mubr.f32.vlgmr.msra.gmra.mrb[2].mxu1 %v314_v53 }
 0x396   :  { %v404_v0 = vpop.f32.mrb[2].mxu1 }
 0x397   :  { %v405_v55 = vadd.f32 %v421_v54, %v404_v0  ;;  %v629_v56 = vpop.f32.mrb[3].mxu1 }
 0x399   :  { %408 = vst [vmem:[%s1045_s9] sm:$0xff] %v405_v55 }

</bundles_post_ra>
